<compile_context>
chip_gen: v6e
topology: v6e:2x2x1
jax: 0.10.0
libtpu: 0.0.40
codegen_flags: <defaults>
</compile_context>

<pallas_src>
import functools

import jax
import jax.numpy as jnp
from jax.experimental import pallas as pl
from jax.experimental.pallas import tpu as pltpu


def _round_up(x, m):
    return ((x + m - 1) // m) * m


def _dense_embedding_kernel(x_ref, w_ref, b_ref, o_ref, *, neg_slope):
    # x_ref: (tn, F), w_ref: (F, tD), b_ref: (1, tD), o_ref: (tn, tD)
    y = jnp.dot(x_ref[...], w_ref[...], preferred_element_type=jnp.float32)
    y = y + b_ref[...]                      # f32 bias broadcast over rows
    # LeakyReLU (exact for 0 <= slope <= 1): max(y, slope*y)
    o_ref[...] = jnp.maximum(y, neg_slope * y).astype(o_ref.dtype)


def dense_embedding_forward(X_dict, W, b, dense_out_size,
                            flatten_output=False, neg_slope=0.01,
                            tn=512, td=4096, out_dtype=None,
                            vmem_budget_bytes=24 << 20):
    """Pallas implementation of DenseEmbedding.forward.

    Args:
      X_dict: {'cont': (N, F) float array}  (f32 or bf16; bf16 stays bf16)
      W: (F, d0, d1) weight
      b: (d0, d1) bias
      dense_out_size: (d0, d1)
      out_dtype: output dtype; defaults to X's dtype (bf16 in -> bf16 out).
    """
    assert 0.0 <= neg_slope <= 1.0, "max(y, slope*y) trick requires 0 <= slope <= 1"

    X = X_dict["cont"]
    N, F = X.shape
    d0, d1 = dense_out_size
    D = d0 * d1
    assert W.shape == (F, d0, d1), W.shape
    assert b.shape == (d0, d1), b.shape

    # Keep X/W in their native dtype (bf16 -> native MXU path, half HBM traffic);
    # accumulation inside the kernel is always f32.
    compute_dtype = X.dtype
    if out_dtype is None:
        out_dtype = compute_dtype           # output bytes follow input precision
    out_itemsize = jnp.dtype(out_dtype).itemsize

    W2 = W.reshape(F, D).astype(compute_dtype)      # (F, D)
    b2 = b.reshape(1, D).astype(jnp.float32)        # (1, D), f32 bias

    # Lane-dense output: pad D up to a multiple of 128 only when needed; the
    # post-kernel column slice (an extra copy) only exists in that case.
    D_pad = _round_up(D, 128)
    if D_pad != D:
        W2 = jnp.pad(W2, ((0, 0), (0, D_pad - D)))
        b2 = jnp.pad(b2, ((0, 0), (0, D_pad - D)))

    w_itemsize = W2.dtype.itemsize

    # --- D tiling: prefer a single D tile (W + bias DMA'd exactly once, widest
    # stores, 1 effective grid axis). Only tile D for genuinely huge D, and then
    # use the largest 128-multiple divisor of D_pad so stores stay wide/unmasked.
    if 2 * F * D_pad * w_itemsize <= vmem_budget_bytes // 4:
        td_eff = D_pad
    else:
        m = D_pad // 128
        td_cap = max(td // 128, 1)
        divisors = [d for d in range(1, m + 1) if m % d == 0 and d <= td_cap]
        td_eff = 128 * (max(divisors) if divisors else 1)

    # --- N tiling: target ~2 MiB of output per grid step (amortizes per-step
    # pipeline overhead), never pad a small batch, and keep >=2 steps along the
    # parallel axis for moderate N so v7x megacore uses both TensorCores.
    target_step_out_bytes = 2 << 20
    tn_target = max(int(tn),
                    _round_up(pl.cdiv(target_step_out_bytes,
                                      td_eff * out_itemsize), 8))
    if N < 8:
        tn_eff = N                          # full-dim block for tiny batches
    else:
        tn_eff = min(tn_target, (N // 8) * 8)
        if N >= 16:
            tn_eff = min(tn_eff, _round_up(pl.cdiv(N, 2), 8))

    def vmem_bytes(t_n, t_d):
        # double-buffered X, W, bias and out blocks
        return (2 * t_n * F * X.dtype.itemsize
                + 2 * F * t_d * w_itemsize
                + 2 * t_d * 4
                + 2 * t_n * t_d * out_itemsize)

    # Shrink the row tile if the working set exceeds the VMEM budget.
    while vmem_bytes(tn_eff, td_eff) > vmem_budget_bytes and tn_eff > 8:
        tn_eff = max(8, _round_up(tn_eff // 2, 8))
    # td_eff shrink is essentially never needed with F in the tens; the divisor
    # branch above already bounds it for huge D.

    grid = (pl.cdiv(N, tn_eff), D_pad // td_eff)

    kernel = functools.partial(_dense_embedding_kernel, neg_slope=neg_slope)

    cost = pl.CostEstimate(
        flops=2 * N * F * D_pad,
        transcendentals=0,
        bytes_accessed=(N * F * X.dtype.itemsize
                        + F * D_pad * w_itemsize
                        + D_pad * 4
                        + N * D_pad * out_itemsize),
    )

    out2 = pl.pallas_call(
        kernel,
        out_shape=jax.ShapeDtypeStruct((N, D_pad), out_dtype),
        grid_spec=pltpu.PrefetchScalarGridSpec(
            num_scalar_prefetch=0,
            grid=grid,
            in_specs=[
                pl.BlockSpec((tn_eff, F), lambda i, j: (i, 0)),    # X row tile
                pl.BlockSpec((F, td_eff), lambda i, j: (0, j)),    # W column tile
                pl.BlockSpec((1, td_eff), lambda i, j: (0, j)),    # bias column tile
            ],
            out_specs=pl.BlockSpec((tn_eff, td_eff), lambda i, j: (i, j)),
        ),
        compiler_params=pltpu.CompilerParams(
            dimension_semantics=("parallel", "parallel"),
            # v5e's scoped-VMEM default is only 16 MiB; raise it explicitly.
            # Cap leaves headroom on v7x (64 MiB physical per TC).
            vmem_limit_bytes=min(vmem_budget_bytes + (8 << 20), 48 << 20),
        ),
        cost_estimate=cost,
    )(X, W2, b2)

    if D_pad != D:
        out2 = out2[:, :D]                  # only materializes when D % 128 != 0

    if flatten_output:
        return out2.reshape(N, D)           # metadata-only reshape
    return out2.reshape(N, d0, d1)


def _reference(X, W, b, dense_out_size, neg_slope=0.01):
    # Pure-JAX reference matching the PyTorch math (f32 compute).
    N, _ = X.shape
    d0, d1 = dense_out_size
    y = jnp.einsum("nf,fij->nij", X.astype(jnp.float32),
                   W.astype(jnp.float32)) + b.astype(jnp.float32)
    y = jnp.where(y >= 0, y, neg_slope * y)
    return y.reshape(N, d0, d1)


if __name__ == "__main__":
    key = jax.random.PRNGKey(0)
    k_x, k_w, k_x2 = jax.random.split(key, 3)

    # Small shapes consistent with the module.
    N = 8                      # n_rows
    num_dims = 16              # num_fields (F)
    dense_out_size = (4, 32)   # embedding_size=(4, 32) -> D = 128 (lane-dense, no pad/slice)
    d0, d1 = dense_out_size

    # xavier_uniform_ bounds for the 3-D weight (PyTorch fan calc).
    fan_in = d0 * d1
    fan_out = num_dims * d1
    bound = (6.0 / (fan_in + fan_out)) ** 0.5
    W = jax.random.uniform(k_w, (num_dims, d0, d1),
                           minval=-bound, maxval=bound, dtype=jnp.float32)
    b = jnp.zeros((d0, d1), dtype=jnp.float32)
    X = jax.random.normal(k_x, (N, num_dims), dtype=jnp.float32)

    # f32 path, tight tolerance.
    out = dense_embedding_forward({"cont": X}, W, b, dense_out_size,
                                  flatten_output=False)
    out = jax.block_until_ready(out)
    ref = _reference(X, W, b, dense_out_size)
    assert out.shape == (N, d0, d1), out.shape
    assert out.dtype == jnp.float32, out.dtype
    assert jnp.allclose(out, ref, atol=1e-5, rtol=1e-5), "f32 mismatch vs reference"

    # flatten_output path (metadata-only reshape of the same kernel output).
    out_flat = jax.block_until_ready(
        dense_embedding_forward({"cont": X}, W, b, dense_out_size,
                                flatten_output=True))
    assert out_flat.shape == (N, d0 * d1), out_flat.shape
    assert jnp.allclose(out_flat, ref.reshape(N, -1), atol=1e-5, rtol=1e-5)

    # Ragged batch + bf16 inputs: no wrapper pad/slice, output follows the
    # compute dtype (bf16), accumulation stays f32 in-kernel; looser tolerance.
    N2 = 300
    X2 = jax.random.normal(k_x2, (N2, num_dims), dtype=jnp.float32)
    out2 = dense_embedding_forward({"cont": X2.astype(jnp.bfloat16)},
                                   W.astype(jnp.bfloat16), b, dense_out_size)
    out2 = jax.block_until_ready(out2)
    ref2 = _reference(X2, W, b, dense_out_size)
    assert out2.shape == (N2, d0, d1), out2.shape
    assert out2.dtype == jnp.bfloat16, out2.dtype
    assert jnp.allclose(out2.astype(jnp.float32), ref2, atol=5e-2, rtol=5e-2), \
        "bf16 mismatch vs reference"

    print("KERNEL_OK")
</pallas_src>

<mosaic_0001>
module attributes {stable_mosaic.version = 11 : i64} {
  func.func @_dense_embedding_kernel(%arg0: i32, %arg1: i32, %arg2: memref<8x16xf32, #tpu.memory_space<vmem>>, %arg3: memref<16x128xf32, #tpu.memory_space<vmem>>, %arg4: memref<1x128xf32, #tpu.memory_space<vmem>>, %arg5: memref<8x128xf32, #tpu.memory_space<vmem>>) attributes {dimension_semantics = [#tpu.dimension_semantics<parallel>, #tpu.dimension_semantics<parallel>], iteration_bounds = array<i64: 1, 1>, scalar_prefetch = 0 : i64, scratch_operands = 0 : i64, tpu.core_type = #tpu.core_type<tc>, window_params = [{transform_indices = @transform_0, window_bounds = array<i64: 8, 16>}, {transform_indices = @transform_1, window_bounds = array<i64: 16, 128>}, {transform_indices = @transform_2, window_bounds = array<i64: 1, 128>}, {transform_indices = @transform_3, window_bounds = array<i64: 8, 128>}]} {
    %c0 = arith.constant 0 : index
    %c0_0 = arith.constant 0 : index
    %0 = vector.load %arg2[%c0, %c0_0] : memref<8x16xf32, #tpu.memory_space<vmem>>, vector<8x16xf32>
    %c0_1 = arith.constant 0 : index
    %c0_2 = arith.constant 0 : index
    %1 = vector.load %arg3[%c0_1, %c0_2] : memref<16x128xf32, #tpu.memory_space<vmem>>, vector<16x128xf32>
    %cst = arith.constant dense<0.000000e+00> : vector<8x128xf32>
    %2 = tpu.matmul %0, %1, %cst {dimension_numbers = #tpu.dot_dimension_numbers<[1], [0], [0], [1], [0, 0, 1, 1], [], []>} : vector<8x16xf32>, vector<16x128xf32>, vector<8x128xf32> -> vector<8x128xf32>
    %c0_3 = arith.constant 0 : index
    %c0_4 = arith.constant 0 : index
    %3 = vector.load %arg4[%c0_3, %c0_4] : memref<1x128xf32, #tpu.memory_space<vmem>>, vector<1x128xf32>
    %4 = vector.broadcast %3 : vector<1x128xf32> to vector<8x128xf32>
    %5 = arith.addf %2, %4 : vector<8x128xf32>
    %cst_5 = arith.constant 0.00999999977 : f32
    %6 = vector.broadcast %cst_5 : f32 to vector<8x128xf32>
    %7 = arith.mulf %6, %5 : vector<8x128xf32>
    %8 = arith.maximumf %5, %7 : vector<8x128xf32>
    %c0_6 = arith.constant 0 : index
    %c0_7 = arith.constant 0 : index
    %9 = vector.load %arg5[%c0_6, %c0_7] : memref<8x128xf32, #tpu.memory_space<vmem>>, vector<8x128xf32>
    tpu.vector_store %arg5[%c0_6, %c0_7], %8 {strides = array<i32>} : memref<8x128xf32, #tpu.memory_space<vmem>>, vector<8x128xf32>,
    return
  }
  func.func @transform_0(%arg0: i32, %arg1: i32) -> (i32, i32) {
    %c0_i32 = arith.constant 0 : i32
    %c0_i32_0 = arith.constant 0 : i32
    return %arg0, %c0_i32 : i32, i32
  }
  func.func @transform_1(%arg0: i32, %arg1: i32) -> (i32, i32) {
    %c0_i32 = arith.constant 0 : i32
    %c0_i32_0 = arith.constant 0 : i32
    return %c0_i32, %arg1 : i32, i32
  }
  func.func @transform_2(%arg0: i32, %arg1: i32) -> (i32, i32) {
    %c0_i32 = arith.constant 0 : i32
    %c0_i32_0 = arith.constant 0 : i32
    return %c0_i32, %arg1 : i32, i32
  }
  func.func @transform_3(%arg0: i32, %arg1: i32) -> (i32, i32) {
    %c0_i32 = arith.constant 0 : i32
    return %arg0, %arg1 : i32, i32
  }
}

</mosaic_0001>

<bundles_post_ra>
// kernel: tpu_custom_call.1
= control target key start
LH: loop header
LB: loop body
LE: loop exit
PB: predicated region body
PF: predicated region fallthrough
CT: control target
= control target key end

     0   :  { %8 = vsyncpa [#allocation3], 0  ;;  %s268_s0 = inlined_call_operand.hbm [shape: f32[8,16], index: 0, kind: input, shape index: {}]   ;;  %s269_s1 = inlined_call_operand.hbm [shape: f32[16,128], index: 1, kind: input, shape index: {}]   ;;  %s270_s2 = inlined_call_operand.vmem [shape: f32[1,128], index: 2, kind: input, shape index: {}]   ;;  %s271_s3 = inlined_call_operand.hbm [shape: f32[8,128], index: 3, kind: output, shape index: {}]  }
   0x1   :  { %9 = vsyncpa [#allocation6], 0 }
   0x2   :  { %10 = vsyncpa [#allocation4], 0  ;;  %s229_s12 = smov [#allocation2]   ;;  %s230_s14 = smov [#allocation5]  }
   0x3   :  { %s17_s13 = sshll.u32 %s229_s12, 4  ;;  %s26_s15 = sshll.u32 %s230_s14, 4  ;;  %s18_s13 = int_to_ptr.vmem [resolvable:$true] %s17_s13  ;;  %s27_s15 = int_to_ptr.vmem [resolvable:$true] %s26_s15 }
   0x4   :  { %s171_s16 = scalar_lea.vmem %s18_s13, 128  ;;  %p176_p1 = scmp.lt.s32.totalorder %s18_s13, %s18_s13 }
   0x5   :  { %p172_p0 = scmp.ne.s32.totalorder %s18_s13, %s171_s16  ;;  %p177_p2 = scmp.lt.s32.totalorder %s171_s16, %s171_s16 }
   0x7   :  { %p178_p3 = por %p177_p2, %p176_p1 }
   0x9   :  { %p179_p4 = pnand %p178_p3, %p172_p0 }
   0xb   :  { %182 = shalt.err (!%p179_p4)
}
   0xc   :  { %20 = dma.hbm_to_vmem [thread:$0]  %s268_s0, 128, %s18_s13, [#allocation3]  }
   0xd   :  { %s191_s19 = scalar_lea.vmem %s27_s15, 256  ;;  %p196_p6 = scmp.lt.s32.totalorder %s27_s15, %s27_s15 }
   0xe   :  { %p192_p5 = scmp.ne.s32.totalorder %s27_s15, %s191_s19  ;;  %p197_p7 = scmp.lt.s32.totalorder %s191_s19, %s191_s19 }
  0x10   :  { %p198_p8 = por %p197_p7, %p196_p6 }
  0x12   :  { %p199_p9 = pnand %p198_p8, %p192_p5 }
  0x14   :  { %202 = shalt.err (!%p199_p9)
}
  0x15   :  { %s231_s20 = smov 128   ;;  %s232_s21 = smov 8  }
  0x16   :  { %32 = dma.hbm_to_vmem [thread:$0]  %s269_s1, 256, %s27_s15, [#allocation6], %s231_s20, %s231_s20, %s232_s21  }
  0x17   :  { %223 = dma.done.wait [#allocation3], 128  }
  0x18   :  { %224 = vsyncadd [#allocation3], 4294967168 }
  0x19   :  { %225 = dma.done.wait [#allocation6], 256  }
  0x1a   :  { %226 = vsyncadd [#allocation6], 4294967040  ;;  %v233_v0 = vmov 0.0   ;;  %vm234_vm0 = vmmov 0   ;;  %v43_v1 = vld [vmem:[#allocation5 + $0x8] sm:$0xff]  ;;  %v42_v2 = vld [vmem:[#allocation5] sm:$0xff] }
  0x1b   :  { %149 = vmatprep.subr.mxu0 %v233_v0  ;;  %153 = vmatprep.mubr.msk.f32.mxu0 %vm234_vm0, %v233_v0  ;;  %v41_v3 = vld [vmem:[#allocation2] sm:$0xff]  ;;  %vm51_vm1 = vcmask 130048   ;;  %s235_s1 = smov [#allocation7]  }
  0x1c   :  { %150 = vmatpush3.msra.mxu0 %v43_v1  ;;  %v144_v4 = vld [vmem:[%s270_s2] ss:$0 sm:$0xff]  ;;  %s134_s25 = sshll.u32 %s235_s1, 4  ;;  %s135_s25 = int_to_ptr.vmem [resolvable:$true] %s134_s25 }
  0x1d   :  { %151 = vmatprep.subr.mxu0 %v233_v0  ;;  %s203_s26 = scalar_lea.vmem %s135_s25, 128  ;;  %p208_p11 = scmp.lt.s32.totalorder %s135_s25, %s135_s25 }
  0x1e   :  { %152 = vmatpush3.msra.mxu0 %v42_v2  ;;  %p204_p10 = scmp.ne.s32.totalorder %s135_s25, %s203_s26  ;;  %p209_p12 = scmp.lt.s32.totalorder %s203_s26, %s203_s26 }
  0x1f   :  { %154 = vmatmul.mubr.msk.f32.vlgmr.msra.gmra.mxu0 %vm51_vm1, %v41_v3 }
  0x20   :  { %p210_p13 = por %p209_p12, %p208_p11 }
  0x22   :  { %p211_p0 = pnand %p210_p13, %p204_p10 }
  0xdf   :  { %v121_v5 = vpop.f32.mrf.mxu0 }
  0xe0   :  { %v122_v6 = vadd.f32 %v144_v4, %v121_v5 }
  0xe1   :  { %v155_v7 = vpop.f32.mrf.mxu0 }
  0xe2   :  { %v125_v8 = vmul.f32 0.01, %v122_v6 }
  0xe4   :  { %v126_v9 = vmax.f32 %v122_v6, %v125_v8 }
  0xe6   :  { %127 = vst [vmem:[#allocation7] sm:$0xff] %v126_v9 }
  0xe7   :  { %214 = shalt.err (!%p211_p0)
}
  0xe8   :  { %137 = dma.vmem_to_hbm [thread:$0]  %s135_s25, 128, %s271_s3, [#allocation4]  }
  0xe9   :  { %227 = dma.done.wait [#allocation4], 128  }
  0xea   :  { %228 = vsyncadd [#allocation4], 4294967168 }
  0xeb   :  { %141 = vsyncpa [#allocation3], 1 }
  0xec   :  { %142 = vsyncpa [#allocation6], 1 }
  0xed   :  { %143 = vsyncpa [#allocation4], 1 }

</bundles_post_ra>
